<compile_context>
chip_gen: v7x
topology: tpu7x:2x2x1
jax: 0.10.0
libtpu: 0.0.40
codegen_flags: <defaults>
</compile_context>

<pallas_src>
import math

import jax
import jax.numpy as jnp
from jax.experimental import pallas as pl
from jax.experimental.pallas import tpu as pltpu


# ----------------------------- kernel body ---------------------------------


def _lora_kernel(x_ref, a_ref, b_ref, o_ref):
    # x_ref: (tm, H) in x's native dtype; a_ref: (H, r); b_ref: (r, Dout).
    # Cast x to the weight/compute dtype in-kernel (free VPU work, hidden under
    # the streaming DMA), accumulate both matmuls in f32, cast once on store.
    x = x_ref[...].astype(a_ref.dtype)
    t = jnp.dot(x, a_ref[...], preferred_element_type=jnp.float32)
    # Keep t in f32 for the second dot (r is tiny -> negligible cost, avoids an
    # extra bf16 quantization of the intermediate).
    y = jnp.dot(t, b_ref[...].astype(jnp.float32),
                preferred_element_type=jnp.float32)
    o_ref[...] = y.astype(o_ref.dtype)


# ----------------------------- host-side helpers ----------------------------


def _round_up(x, m):
    return ((x + m - 1) // m) * m


def _choose_tm(m, h, x_itemsize, sublane, *, target_tile_bytes=4 << 20,
               min_steps=8):
    """Row-tile size: bytes-based (multi-MiB x tiles), >= min_steps grid steps."""
    # Aim for a multi-MiB streamed x tile (per-step overhead ~0.35us dominates
    # tiny steps; the tile-size curve plateaus past a few MiB).
    tm = max(sublane, target_tile_bytes // (h * x_itemsize))
    # Guarantee enough grid steps so the ("parallel",) axis can shard the row
    # tiles across both TensorCores on v7x (costs nothing on v5e/v6e).
    tm_steps = _round_up(pl.cdiv(m, min_steps), sublane)
    tm = min(tm, tm_steps)
    tm = max(sublane, (tm // sublane) * sublane)
    return int(tm)


def prepare_lora_params(a_w, b_w, dtype=None):
    """Pre-transpose the LoRA weights once (call at param-load time).

    a_w: [r, in_features] (PyTorch layout), b_w: [out_features, r].
    Returns (a_t [H, r], b_t [r, out_features]) in `dtype` (default: a_w.dtype).
    No lane padding: the kernel writes the (M, out_features) slab directly.
    """
    r, h = a_w.shape
    dout, r2 = b_w.shape
    assert r == r2
    dtype = dtype or a_w.dtype
    a_t = a_w.T.astype(dtype)            # (H, r)
    b_t = b_w.T.astype(dtype)            # (r, Dout)
    return a_t, b_t


def lora_router_forward(x, a_t, b_t, *, tm=None, target_tile_bytes=4 << 20):
    """x: [B, S, in_features]; a_t: [H, r]; b_t: [r, out_features]."""
    B, S, H = x.shape
    Hin, r = a_t.shape
    r2, dout = b_t.shape
    assert H == Hin and r == r2

    M = B * S
    x2 = x.reshape(M, H)                  # pure reshape: no cast, no pad

    x_itemsize = jnp.dtype(x.dtype).itemsize
    w_itemsize = jnp.dtype(a_t.dtype).itemsize
    sublane = max(8, 32 // x_itemsize)    # 8 for f32, 16 for bf16 inputs

    if tm is None:
        tm = _choose_tm(M, H, x_itemsize, sublane,
                        target_tile_bytes=target_tile_bytes)

    grid = (pl.cdiv(M, tm),)              # ragged last block handled by Pallas

    # VMEM actually needed: double-buffered streamed x/out tiles + resident
    # weights.  Cap the scoped limit at 48 MiB -> safe on v7x's 64 MiB/TC and
    # still well above v5e's ~16 MiB default.
    tile_bytes = tm * (H * x_itemsize + dout * x_itemsize)
    weight_bytes = (H * r + r * dout) * w_itemsize
    vmem_needed = 2 * tile_bytes + weight_bytes
    vmem_limit = int(min(48 << 20, max(2 * vmem_needed + (4 << 20), 32 << 20)))

    bytes_accessed = (
        M * H * x_itemsize            # read x (no extra cast/pad passes)
        + M * dout * x_itemsize       # write y (no lane padding, no slice pass)
        + weight_bytes                # weights read once, stay VMEM-resident
    )

    out = pl.pallas_call(
        _lora_kernel,
        out_shape=jax.ShapeDtypeStruct((M, dout), x.dtype),
        grid_spec=pltpu.PrefetchScalarGridSpec(
            num_scalar_prefetch=0,
            grid=grid,
            in_specs=[
                pl.BlockSpec((tm, H), lambda i: (i, 0)),     # streamed x tile
                pl.BlockSpec((H, r), lambda i: (0, 0)),      # A^T, VMEM-resident
                pl.BlockSpec((r, dout), lambda i: (0, 0)),   # B^T, VMEM-resident
            ],
            out_specs=pl.BlockSpec((tm, dout), lambda i: (i, 0)),
        ),
        compiler_params=pltpu.CompilerParams(
            dimension_semantics=("parallel",),               # megacore on v7x
            vmem_limit_bytes=vmem_limit,
        ),
        cost_estimate=pl.CostEstimate(
            flops=2 * M * r * (H + dout),
            transcendentals=0,
            bytes_accessed=int(bytes_accessed),
        ),
    )(x2, a_t, b_t)

    return out.reshape(B, S, dout)


def _kaiming_uniform_linear(key, out_f, in_f, dtype=jnp.float32):
    # nn.Linear default init == kaiming_uniform_(a=sqrt(5)): bound = 1/sqrt(fan_in)
    bound = 1.0 / math.sqrt(in_f)
    return jax.random.uniform(key, (out_f, in_f), dtype, minval=-bound, maxval=bound)


if __name__ == "__main__":
    # Small deterministic setup: batch=2, seq=8, in_features=32, r=8, out_features=16
    B, S, Hin, R, Hout = 2, 8, 32, 8, 16

    key = jax.random.PRNGKey(0)
    kx, ka, kb = jax.random.split(key, 3)

    x = jax.random.normal(kx, (B, S, Hin), dtype=jnp.float32)
    # NOTE: _reset_params() is not called in __init__, so both weights carry
    # the default nn.Linear kaiming-uniform init (non-zero) -> meaningful check.
    lora_A_w = _kaiming_uniform_linear(ka, R, Hin)     # (r, in_features)
    lora_B_w = _kaiming_uniform_linear(kb, Hout, R)    # (out_features, r)

    # ---- f32 path: exact check vs pure-JAX reference -----------------------
    a_t, b_t = prepare_lora_params(lora_A_w, lora_B_w)
    y = jax.block_until_ready(lora_router_forward(x, a_t, b_t))

    y_ref = jnp.einsum("bsh,rh->bsr", x, lora_A_w)
    y_ref = jnp.einsum("bsr,or->bso", y_ref, lora_B_w)

    assert y.shape == (B, S, Hout)
    assert jnp.allclose(y, y_ref, atol=1e-5, rtol=1e-5), "f32 mismatch vs reference"

    # ---- bf16-weight path: x streams in f32, cast to bf16 inside the kernel
    a_t16, b_t16 = prepare_lora_params(lora_A_w, lora_B_w, dtype=jnp.bfloat16)
    y16 = jax.block_until_ready(lora_router_forward(x, a_t16, b_t16))

    xb = x.astype(jnp.bfloat16).astype(jnp.float32)
    ab = lora_A_w.astype(jnp.bfloat16).astype(jnp.float32)
    bb = lora_B_w.astype(jnp.bfloat16).astype(jnp.float32)
    ref16 = jnp.einsum("bsr,or->bso", jnp.einsum("bsh,rh->bsr", xb, ab), bb)
    assert y16.shape == (B, S, Hout)
    assert jnp.allclose(y16.astype(jnp.float32), ref16, atol=2e-2, rtol=2e-2), \
        "bf16 mismatch vs reference"

    print("KERNEL_OK")
</pallas_src>

<mosaic_0001>
module attributes {stable_mosaic.version = 11 : i64} {
  func.func @_lora_kernel(%arg0: i32, %arg1: memref<8x32xf32, #tpu.memory_space<vmem>>, %arg2: memref<32x8xf32, #tpu.memory_space<vmem>>, %arg3: memref<8x16xf32, #tpu.memory_space<vmem>>, %arg4: memref<8x16xf32, #tpu.memory_space<vmem>>) attributes {dimension_semantics = [#tpu.dimension_semantics<parallel>], iteration_bounds = array<i64: 2>, scalar_prefetch = 0 : i64, scratch_operands = 0 : i64, tpu.core_type = #tpu.core_type<tc>, window_params = [{transform_indices = @transform_0, window_bounds = array<i64: 8, 32>}, {pipeline_mode = #tpu.pipeline_mode<synchronous>, transform_indices = @transform_1, window_bounds = array<i64: 32, 8>}, {pipeline_mode = #tpu.pipeline_mode<synchronous>, transform_indices = @transform_2, window_bounds = array<i64: 8, 16>}, {transform_indices = @transform_3, window_bounds = array<i64: 8, 16>}]} {
    %c0 = arith.constant 0 : index
    %c0_0 = arith.constant 0 : index
    %0 = vector.load %arg1[%c0, %c0_0] : memref<8x32xf32, #tpu.memory_space<vmem>>, vector<8x32xf32>
    %c0_1 = arith.constant 0 : index
    %c0_2 = arith.constant 0 : index
    %1 = vector.load %arg2[%c0_1, %c0_2] : memref<32x8xf32, #tpu.memory_space<vmem>>, vector<32x8xf32>
    %cst = arith.constant dense<0.000000e+00> : vector<8x8xf32>
    %2 = tpu.matmul %0, %1, %cst {dimension_numbers = #tpu.dot_dimension_numbers<[1], [0], [0], [1], [0, 0, 1, 1], [], []>} : vector<8x32xf32>, vector<32x8xf32>, vector<8x8xf32> -> vector<8x8xf32>
    %c0_3 = arith.constant 0 : index
    %c0_4 = arith.constant 0 : index
    %3 = vector.load %arg3[%c0_3, %c0_4] : memref<8x16xf32, #tpu.memory_space<vmem>>, vector<8x16xf32>
    %cst_5 = arith.constant dense<0.000000e+00> : vector<8x16xf32>
    %4 = tpu.matmul %2, %3, %cst_5 {dimension_numbers = #tpu.dot_dimension_numbers<[1], [0], [0], [1], [0, 0, 1, 1], [], []>} : vector<8x8xf32>, vector<8x16xf32>, vector<8x16xf32> -> vector<8x16xf32>
    %c0_6 = arith.constant 0 : index
    %c0_7 = arith.constant 0 : index
    %5 = vector.load %arg4[%c0_6, %c0_7] : memref<8x16xf32, #tpu.memory_space<vmem>>, vector<8x16xf32>
    tpu.vector_store %arg4[%c0_6, %c0_7], %4 {strides = array<i32>} : memref<8x16xf32, #tpu.memory_space<vmem>>, vector<8x16xf32>,
    return
  }
  func.func @transform_0(%arg0: i32) -> (i32, i32) {
    %c0_i32 = arith.constant 0 : i32
    %c0_i32_0 = arith.constant 0 : i32
    return %arg0, %c0_i32 : i32, i32
  }
  func.func @transform_1(%arg0: i32) -> (i32, i32) {
    %c0_i32 = arith.constant 0 : i32
    %c0_i32_0 = arith.constant 0 : i32
    %c0_i32_1 = arith.constant 0 : i32
    return %c0_i32, %c0_i32_0 : i32, i32
  }
  func.func @transform_2(%arg0: i32) -> (i32, i32) {
    %c0_i32 = arith.constant 0 : i32
    %c0_i32_0 = arith.constant 0 : i32
    %c0_i32_1 = arith.constant 0 : i32
    return %c0_i32, %c0_i32_0 : i32, i32
  }
  func.func @transform_3(%arg0: i32) -> (i32, i32) {
    %c0_i32 = arith.constant 0 : i32
    %c0_i32_0 = arith.constant 0 : i32
    return %arg0, %c0_i32 : i32, i32
  }
}

</mosaic_0001>

<bundles_post_ra>
// kernel: tpu_custom_call.1
= control target key start
LH: loop header
LB: loop body
LE: loop exit
PB: predicated region body
PF: predicated region fallthrough
CT: control target
= control target key end

     0   :  { %8 = vsyncpa [#allocation3], 0  ;;  %s681_s0 = inlined_call_operand.vmem [shape: f32[16,32], index: 0, kind: input, shape index: {}]   ;;  %s682_s1 = inlined_call_operand.vmem [shape: f32[32,8], index: 1, kind: input, shape index: {}]   ;;  %s683_s2 = inlined_call_operand.vmem [shape: f32[8,16], index: 2, kind: input, shape index: {}]   ;;  %s684_s3 = inlined_call_operand.hbm [shape: f32[16,16], index: 3, kind: output, shape index: {}]  }
   0x1   :  { %10 = vsyncpa [#allocation3 + $0x1], 0  ;;  %s566_s12 = smov 0   ;;  %s568_s13 = smov 0  }
   0x2   :  { %s570_s14 = smov 0   ;;  %s572_s15 = smov 0  }
   0x3 LB: > { %s587_s16 = sadd.s32 4294967295, %s540_s15   ;;  %s395_s17 = sadd.s32 4294967294, %s540_s15   ;;  %s540_s15 = sphi %s572_s15, %s690_s15   ;;  %s536_s14 = sphi %s570_s14, %s689_s14   ;;  %s532_s13 = sphi %s568_s13, %s688_s13   ;;  %s528_s12 = sphi %s566_s12, %s687_s12  }
   0x4   : > { %s591_s18 = sadd.s32 1, %s540_s15   ;;  %s91_s19 = sadd.s32 1, %s536_s14 }
   0x5   : > { %s88_s20 = ssub.s32 %s540_s15, %s591_s18  ;;  %p101_p0 = scmp.ne.s32.totalorder %s536_s14, %s532_s13 }
   0x6   : > { %p89_p1 = scmp.eq.s32.totalorder %s88_s20, 0  ;;  %p102_p2 = scmp.eq.s32.totalorder %s587_s16, 1 }
   0x7   : > { %p107_p3 = scmp.ne.s32.totalorder %s532_s13, %s528_s12  ;;  %p108_p4 = scmp.eq.s32.totalorder %s395_s17, 1 }
   0x8   : > { %s602_s21 = scalar_select %p89_p1, %s536_s14, %s91_s19  }
   0x9   : > { %p604_p5 = por %p102_p2, %p101_p0  ;;  %p608_p6 = por %p108_p4, %p107_p3 }
   0xa   : > { %p398_p7 = scmp.ge.s32.totalorder %s540_s15, 1  ;;  %p139_p8 = scmp.lt.s32.totalorder %s540_s15, 3 }
   0xc   : > { %p140_p9 = pnand %p398_p7, %p139_p8 }
   0xd   : > { %v167_v0 = vld [vmem:[%s682_s1] sm:$0xff] (!%p140_p9)  ;;  %v168_v1 = vld [vmem:[%s682_s1 + $0x8] sm:$0xff] (!%p140_p9)  ;;  %v169_v2 = vld [vmem:[%s682_s1 + $0x10] sm:$0xff] (!%p140_p9)  ;;  %v542_v3 = vmov (!%p140_p9), 0.0|0.0   ;;  %vm543_vm0 = vmmov (!%p140_p9), 0   ;;  %v544_v6 = vmov (!%p140_p9), 0.0  }
   0xe   : > { %143 = sbr.rel (%p140_p9) target bundleno = 464 (0x1d0), region = 32  ;;  %430 = vmatprep.subr.bf16.mxu0 (!%p140_p9), %v542_v3  ;;  %v431_v4 = vpack.c.bf16 (!%p140_p9), %v168_v1, %v167_v0  ;;  %v170_v5 = vld [vmem:[%s682_s1 + $0x18] sm:$0xff] (!%p140_p9)  ;;  %422 = vmatprep.mubr.msk.f32.mxu0 (!%p140_p9), %vm543_vm0, %v544_v6  ;;  %p162_p10 = scmp.lt.s32.totalorder (!%p140_p9), %s587_s16, 1  ;;  %vm171_vm1 = vcmask (!%p140_p9), 261120   ;;  %v245_v9 = vld [vmem:[%s683_s2] sm:$0xff] (!%p140_p9)  ;;  %vm246_vm2 = vcmask (!%p140_p9), 64512  }
   0xf   : > { %425 = vmatprep.subr.mxu1 (!%p140_p9), %v544_v6  ;;  %427 = vmatprep.mubr.msk.f32.mxu1 (!%p140_p9), %vm543_vm0, %v544_v6  ;;  %v434_v7 = vpack.c.bf16 (!%p140_p9), %v170_v5, %v169_v2  ;;  %s159_s17 = sand.u32 (!%p140_p9), 1, %s532_s13   ;;  %s404_s20 = sshll.u32 (!%p140_p9), %s587_s16, 7  ;;  %vm320_vm3 = vcmask (!%p140_p9), 130048  }
  0x10   : > { %432 = vmatpush3.bf16.msra.mxu0 (!%p140_p9), %v431_v4  ;;  %426 = vmatpush3.msra.mxu1 (!%p140_p9), %v245_v9  ;;  %s399_s19 = sshll.u32 (!%p140_p9), %s159_s17, 3  ;;  %s639_s28 = scalar_lea.hbm (!%p140_p9), %s684_s3, %s404_s20 }
  0x11   : > { %433 = vmatprep.subr.bf16.mxu0 (!%p140_p9), %v542_v3  ;;  %s161_s24 = scalar_lea.vmem (!%p140_p9), [#allocation2], %s399_s19  ;;  %s323_s29 = scalar_lea.sflag (!%p140_p9), [#allocation3], %s159_s17 }
  0x12   : > { %s336_s25 = sshll.u32 (!%p140_p9), %s161_s24, 4  ;;  %s641_s25 = int_to_ptr.vmem [resolvable:$true] %s336_s25 }
  0x13   : > { %s478_s30 = scalar_lea.vmem (!%p140_p9), %s641_s25, 128 }
  0x14   : > { %435 = vmatpush3.bf16.msra.mxu0 (!%p140_p9), %v434_v7  ;;  %p479_p11 = scmp.ne.s32.totalorder (!%p140_p9), %s641_s25, %s478_s30 }
  0x15   : > { %s163_s5 = scalar_select %p162_p10, %s587_s16, 1 }
  0x16   : > { %p480_p12 = pnand %p479_p11, %p604_p5  ;;  %s545_s16 = smov [#allocation2]  }
  0x17   : > { %s400_s6 = sshll.u32 %s163_s5, 3  ;;  %s482_s4 = sshll.u32 %s545_s16, 4  ;;  %s483_s4 = int_to_ptr.vmem [resolvable:$false] %s482_s4 }
  0x18   : > { %s165_s9 = scalar_lea.vmem %s681_s0, %s400_s6  ;;  %p481_p13 = pneg %p480_p12 }
  0x19   : > { %v166_v8 = vld [vmem:[%s165_s9] sm:$0xff]  ;;  %s484_s5 = scalar_lea.vmem %s483_s4, 256  ;;  %p485_p0 = scmp.lt.s32.totalorder %s641_s25, %s483_s4 }
  0x1a   : > { %423 = vmatmul.mubr.msk.f32.vlgmr.msra.gmra.mrb[0].mxu0 %vm171_vm1, %v166_v8  ;;  %p486_p1 = scmp.lt.s32.totalorder %s484_s5, %s478_s30 }
  0x1c   : > { %p487_p2 = por %p486_p1, %p485_p0 }
  0x1e   : > { %p488_p3 = pnand %p487_p2, %p481_p13 }
  0xed   : > { %v241_v10 = vpop.f32.mrb[0].mxu0 }
  0xee   : > { %v424_v11 = vpop.f32.mrb[1].mxu0  ;;  %428 = vmatmul.mubr.msk.f32.vlgmr.msra.gmra.mrb[0].mxu1 %vm246_vm2, %v241_v10 }
 0x1c1   : > { %v316_v12 = vpop.f32.mrb[0].mxu1 }
 0x1c2   : > { %321 = vst.msk [vmem:[%s161_s24] sm:$0xff] %vm320_vm3, %v316_v12  ;;  %v429_v13 = vpop.f32.mrb[1].mxu1 }
 0x1c3   : > { %491 = shalt.err (!%p488_p3)
}
 0x1c4   : > { %s492_s6 = scalar_lea.hbm %s639_s28, 128  ;;  %s496_s9 = scalar_lea.hbm %s684_s3, 256 }
 0x1c5   : > { %p493_p4 = scmp.ne.s32.totalorder %s639_s28, %s492_s6  ;;  %p497_p9 = scmp.lt.u32.totalorder %s639_s28, %s684_s3 }
 0x1c6   : > { %p498_p10 = scmp.lt.u32.totalorder %s496_s9, %s492_s6  ;;  %p500_p12 = scmp.lt.u32.totalorder %s492_s6, %s639_s28 }
 0x1c7   : > { %p494_p7 = pnand %p493_p4, %p604_p5 }
 0x1c8   : > { %p499_p11 = por %p498_p10, %p497_p9 }
 0x1c9   : > { %p495_p8 = pneg %p494_p7 }
 0x1ca   : > { %p501_p13 = por %p500_p12, %p499_p11 }
 0x1cc   : > { %p502_p0 = pnand %p501_p13, %p495_p8 }
 0x1ce   : > { %505 = shalt.err (!%p502_p0)
}
 0x1cf   : > { %436 = dma.vmem_to_hbm [thread:$0]  (%p604_p5), %s641_s25, 128, %s639_s28, %s323_s29  }
 0x1d0 PF: > { %p442_p1 = scmp.ge.s32.totalorder %s540_s15, 2  ;;  %s348_s17 = sand.u32 1, %s528_s12  }
 0x1d1   : > { %s349_s19 = scalar_lea.sflag [#allocation3], %s348_s17 }
 0x1d2   : > { %p439_p2 = pnand %p442_p1, %p608_p6 }
 0x1d4   : > { %523 = dma.done.wait (!%p439_p2), %s349_s19, 128  }
 0x1d5   : > { %525 = vsyncadd (!%p439_p2), %s349_s19, 4294967168  ;;  %p13_p3 = scmp.ge.s32.totalorder %s591_s18, 4   ;;  %s687_s12 = smov %s532_s13 }
 0x1d6   : > { %s688_s13 = smov %s536_s14  ;;  %s689_s14 = smov %s602_s21 }
 0x1d7   : > { %s690_s15 = smov %s591_s18  ;;  %15 = sbr.rel (!%p13_p3) target bundleno = 3 (0x3), region = 67 }
 0x1de   :  { %354 = vsyncpa [#allocation3], 1 }
 0x1df   :  { %356 = vsyncpa [#allocation3 + $0x1], 1 }

</bundles_post_ra>
